<compile_context>
chip_gen: v6e
topology: v6e:2x2x1
jax: 0.10.0
libtpu: 0.0.40
codegen_flags: <defaults>
</compile_context>

<pallas_src>
import jax
import jax.numpy as jnp
from jax import lax
from jax.experimental import pallas as pl
from jax.experimental.pallas import tpu as pltpu


# Contract the last dim of both operands (A @ B.T), the standard "NT" matmul.
_NT_DIMS = (((1,), (1,)), ((), ()))


def attention_kernel(enc_ref, dec_ref, w1_ref, w2_ref, v_ref, out_ref):
    # enc_ref : [1, tn, E]   encoder tile for (batch b, seq tile j)
    # dec_ref : [1, 1, D]    decoder hidden state for batch b
    # w1_ref  : [H, E]       nn.Linear W1 weight, native [out, in] layout
    # w2_ref  : [H, D]       nn.Linear W2 weight
    # v_ref   : [H, 1]       V weight as a column
    # out_ref : [1, 1, tn]   lane-dense logits tile
    enc = enc_ref[0]                                            # [tn, E]

    # W1 @ enc^T : single MXU matmul, seq positions on the lane axis.
    h_enc = lax.dot_general(
        w1_ref[...], enc, _NT_DIMS, preferred_element_type=jnp.float32
    )                                                           # [H, tn]

    # W2 @ dec^T : degenerate N=1 matmul, fused here instead of a separate
    # XLA einsum + repeat; the MXU has massive slack at these sizes.
    h_dec = lax.dot_general(
        w2_ref[...], dec_ref[0], _NT_DIMS, preferred_element_type=jnp.float32
    )                                                           # [H, 1]

    # Broadcast along lanes via the add; tanh on EUP, mul on VPU.
    t = jnp.tanh(h_enc + h_dec)                                 # [H, tn]

    # V projection == reduction over the hidden (sublane) axis:
    # VPU multiply + sublane reduce; result is already a lane-dense row.
    scores = jnp.sum(t * v_ref[...], axis=0, keepdims=True)     # [1, tn]
    out_ref[0] = scores.astype(out_ref.dtype)


def _round_up(x, m):
    return ((x + m - 1) // m) * m


@jax.jit
def attention_forward(encoder_hiddens, hidden_decoder, W1, W2, V):
    """encoder_hiddens: [B, Li, E], hidden_decoder: [B, 1, D]
    W1: [H, E], W2: [H, D], V: [1, H]   (PyTorch nn.Linear weight layouts)
    returns logits: [B, Li]
    """
    B, Li, E = encoder_hiddens.shape
    _, _, D = hidden_decoder.shape
    H = W1.shape[0]

    # Lane-dense sequence tiling: tn multiple of 128, capped at 512.
    tn = min(512, _round_up(Li, 128))
    Li_pad = _round_up(Li, tn)

    if Li_pad != Li:
        enc = jnp.pad(encoder_hiddens, ((0, 0), (0, Li_pad - Li), (0, 0)))
    else:
        enc = encoder_hiddens

    v_col = V.reshape(H, 1)   # [1, H] -> [H, 1]; contiguous, no data movement

    grid = (B, Li_pad // tn)

    out = pl.pallas_call(
        attention_kernel,
        out_shape=jax.ShapeDtypeStruct((B, 1, Li_pad), jnp.float32),
        grid=grid,
        in_specs=[
            # Streaming input: one (tn, E) encoder tile per grid step.
            pl.BlockSpec((1, tn, E), lambda b, j: (b, j, 0)),
            # Decoder state for the current batch element (broadcast in-kernel).
            pl.BlockSpec((1, 1, D), lambda b, j: (b, 0, 0)),
            # Weights: constant index_map -> stay VMEM-resident.
            pl.BlockSpec((H, E), lambda b, j: (0, 0)),
            pl.BlockSpec((H, D), lambda b, j: (0, 0)),
            pl.BlockSpec((H, 1), lambda b, j: (0, 0)),
        ],
        out_specs=pl.BlockSpec((1, 1, tn), lambda b, j: (b, 0, j)),
        compiler_params=pltpu.CompilerParams(
            dimension_semantics=("parallel", "parallel"),
        ),
    )(enc, hidden_decoder, W1, W2, v_col)

    return out[:, 0, :Li]


def attention_reference(encoder_hiddens, hidden_decoder, W1, W2, V):
    h = jnp.einsum("ble,he->blh", encoder_hiddens, W1) + jnp.einsum(
        "bod,hd->boh", hidden_decoder, W2
    )
    elementwise_product = jnp.einsum("blh,oh->blo", jnp.tanh(h), V)
    return jnp.sum(elementwise_product, axis=-1)


if __name__ == "__main__":
    # Small shapes implied by the module: batch=2, seq=8, enc/dec/hidden dims = 32.
    B, Li = 2, 8
    E, D, H = 32, 32, 32

    key = jax.random.PRNGKey(0)
    k_enc, k_dec, k_w1, k_w2, k_v = jax.random.split(key, 5)

    encoder_hiddens = jax.random.normal(k_enc, (B, Li, E), dtype=jnp.float32)
    hidden_decoder = jax.random.normal(k_dec, (B, 1, D), dtype=jnp.float32)

    # nn.Linear weight shapes: [out_features, in_features].
    W1 = jax.random.normal(k_w1, (H, E), dtype=jnp.float32) * 0.1
    W2 = jax.random.normal(k_w2, (H, D), dtype=jnp.float32) * 0.1
    V = jax.random.normal(k_v, (1, H), dtype=jnp.float32) * 0.1

    logits = attention_forward(encoder_hiddens, hidden_decoder, W1, W2, V)
    logits = jax.block_until_ready(logits)

    ref = attention_reference(encoder_hiddens, hidden_decoder, W1, W2, V)
    assert logits.shape == (B, Li), logits.shape
    assert jnp.allclose(logits, ref, atol=1e-3, rtol=1e-3), "mismatch vs reference"

    print("KERNEL_OK")
</pallas_src>

<mosaic_0001>
module attributes {stable_mosaic.version = 11 : i64} {
  func.func @attention_kernel(%arg0: i32, %arg1: i32, %arg2: memref<1x128x32xf32, #tpu.memory_space<vmem>>, %arg3: memref<1x1x32xf32, #tpu.memory_space<vmem>>, %arg4: memref<32x32xf32, #tpu.memory_space<vmem>>, %arg5: memref<32x32xf32, #tpu.memory_space<vmem>>, %arg6: memref<32x1xf32, #tpu.memory_space<vmem>>, %arg7: memref<1x1x128xf32, #tpu.memory_space<vmem>>) attributes {dimension_semantics = [#tpu.dimension_semantics<parallel>, #tpu.dimension_semantics<parallel>], iteration_bounds = array<i64: 2, 1>, scalar_prefetch = 0 : i64, scratch_operands = 0 : i64, tpu.core_type = #tpu.core_type<tc>, window_params = [{transform_indices = @transform_0, window_bounds = array<i64: 1, 128, 32>}, {transform_indices = @transform_1, window_bounds = array<i64: 1, 1, 32>}, {pipeline_mode = #tpu.pipeline_mode<synchronous>, transform_indices = @transform_2, window_bounds = array<i64: 32, 32>}, {pipeline_mode = #tpu.pipeline_mode<synchronous>, transform_indices = @transform_3, window_bounds = array<i64: 32, 32>}, {pipeline_mode = #tpu.pipeline_mode<synchronous>, transform_indices = @transform_4, window_bounds = array<i64: 32, 1>}, {transform_indices = @transform_5, window_bounds = array<i64: 1, 1, 128>}]} {
    %c0 = arith.constant 0 : index
    %c0_0 = arith.constant 0 : index
    %c0_1 = arith.constant 0 : index
    %0 = vector.load %arg2[%c0, %c0_0, %c0_1] : memref<1x128x32xf32, #tpu.memory_space<vmem>>, vector<1x128x32xf32>
    %1 = vector.shape_cast %0 : vector<1x128x32xf32> to vector<128x32xf32>
    %c0_2 = arith.constant 0 : index
    %c0_3 = arith.constant 0 : index
    %2 = vector.load %arg4[%c0_2, %c0_3] : memref<32x32xf32, #tpu.memory_space<vmem>>, vector<32x32xf32>
    %cst = arith.constant dense<0.000000e+00> : vector<32x128xf32>
    %3 = tpu.matmul %2, %1, %cst {dimension_numbers = #tpu.dot_dimension_numbers<[1], [1], [0], [0], [0, 0, 1, 0], [], []>} : vector<32x32xf32>, vector<128x32xf32>, vector<32x128xf32> -> vector<32x128xf32>
    %c0_4 = arith.constant 0 : index
    %c0_5 = arith.constant 0 : index
    %4 = vector.load %arg5[%c0_4, %c0_5] : memref<32x32xf32, #tpu.memory_space<vmem>>, vector<32x32xf32>
    %c0_6 = arith.constant 0 : index
    %c0_7 = arith.constant 0 : index
    %c0_8 = arith.constant 0 : index
    %5 = vector.load %arg3[%c0_6, %c0_7, %c0_8] : memref<1x1x32xf32, #tpu.memory_space<vmem>>, vector<1x1x32xf32>
    %6 = vector.shape_cast %5 : vector<1x1x32xf32> to vector<1x32xf32>
    %cst_9 = arith.constant dense<0.000000e+00> : vector<32x1xf32>
    %7 = tpu.matmul %4, %6, %cst_9 {dimension_numbers = #tpu.dot_dimension_numbers<[1], [1], [0], [0], [0, 0, 1, 0], [], []>} : vector<32x32xf32>, vector<1x32xf32>, vector<32x1xf32> -> vector<32x1xf32>
    %8 = vector.broadcast %7 : vector<32x1xf32> to vector<32x128xf32>
    %9 = arith.addf %3, %8 : vector<32x128xf32>
    %10 = math.tanh %9 : vector<32x128xf32>
    %c0_10 = arith.constant 0 : index
    %c0_11 = arith.constant 0 : index
    %11 = vector.load %arg6[%c0_10, %c0_11] : memref<32x1xf32, #tpu.memory_space<vmem>>, vector<32x1xf32>
    %12 = vector.broadcast %11 : vector<32x1xf32> to vector<32x128xf32>
    %13 = arith.mulf %10, %12 : vector<32x128xf32>
    %cst_12 = arith.constant dense<0.000000e+00> : vector<128xf32>
    %14 = vector.multi_reduction <add>, %13, %cst_12 [0] : vector<32x128xf32> to vector<128xf32>
    %15 = vector.shape_cast %14 : vector<128xf32> to vector<1x128xf32>
    %c0_13 = arith.constant 0 : index
    %c0_14 = arith.constant 0 : index
    %c0_15 = arith.constant 0 : index
    %16 = vector.load %arg7[%c0_13, %c0_14, %c0_15] : memref<1x1x128xf32, #tpu.memory_space<vmem>>, vector<1x1x128xf32>
    %17 = vector.shape_cast %16 : vector<1x1x128xf32> to vector<1x128xf32>
    %18 = vector.shape_cast %15 : vector<1x128xf32> to vector<1x1x128xf32>
    tpu.vector_store %arg7[%c0_13, %c0_14, %c0_15], %18 {strides = array<i32>} : memref<1x1x128xf32, #tpu.memory_space<vmem>>, vector<1x1x128xf32>,
    return
  }
  func.func @transform_0(%arg0: i32, %arg1: i32) -> (i32, i32, i32) {
    %c0_i32 = arith.constant 0 : i32
    %c0_i32_0 = arith.constant 0 : i32
    return %arg0, %arg1, %c0_i32 : i32, i32, i32
  }
  func.func @transform_1(%arg0: i32, %arg1: i32) -> (i32, i32, i32) {
    %c0_i32 = arith.constant 0 : i32
    %c0_i32_0 = arith.constant 0 : i32
    %c0_i32_1 = arith.constant 0 : i32
    return %arg0, %c0_i32, %c0_i32_0 : i32, i32, i32
  }
  func.func @transform_2(%arg0: i32, %arg1: i32) -> (i32, i32) {
    %c0_i32 = arith.constant 0 : i32
    %c0_i32_0 = arith.constant 0 : i32
    %c0_i32_1 = arith.constant 0 : i32
    return %c0_i32, %c0_i32_0 : i32, i32
  }
  func.func @transform_3(%arg0: i32, %arg1: i32) -> (i32, i32) {
    %c0_i32 = arith.constant 0 : i32
    %c0_i32_0 = arith.constant 0 : i32
    %c0_i32_1 = arith.constant 0 : i32
    return %c0_i32, %c0_i32_0 : i32, i32
  }
  func.func @transform_4(%arg0: i32, %arg1: i32) -> (i32, i32) {
    %c0_i32 = arith.constant 0 : i32
    %c0_i32_0 = arith.constant 0 : i32
    %c0_i32_1 = arith.constant 0 : i32
    return %c0_i32, %c0_i32_0 : i32, i32
  }
  func.func @transform_5(%arg0: i32, %arg1: i32) -> (i32, i32, i32) {
    %c0_i32 = arith.constant 0 : i32
    %c0_i32_0 = arith.constant 0 : i32
    return %arg0, %c0_i32, %arg1 : i32, i32, i32
  }
}

</mosaic_0001>

<bundles_post_ra>
// kernel: attention_forward.1
= control target key start
LH: loop header
LB: loop body
LE: loop exit
PB: predicated region body
PF: predicated region fallthrough
CT: control target
= control target key end

     0   :  { %10 = vsyncpa [#allocation3], 0  ;;  %s1120_s0 = inlined_call_operand.vmem [shape: f32[2,128,32], index: 0, kind: input, shape index: {}]   ;;  %s1121_s1 = inlined_call_operand.vmem [shape: f32[2,1,32], index: 1, kind: input, shape index: {}]   ;;  %s1122_s2 = inlined_call_operand.vmem [shape: f32[32,32], index: 2, kind: input, shape index: {}]   ;;  %s1123_s3 = inlined_call_operand.vmem [shape: f32[32,32], index: 3, kind: input, shape index: {}]   ;;  %s1124_s4 = inlined_call_operand.vmem [shape: f32[32,1], index: 4, kind: input, shape index: {}]   ;;  %s1125_s5 = inlined_call_operand.hbm [shape: f32[2,1,128], index: 5, kind: output, shape index: {}]  }
   0x1   :  { %12 = vsyncpa [#allocation3 + $0x1], 0  ;;  %s892_s18 = smov 0   ;;  %s894_s19 = smov 0  }
   0x2   :  { %s896_s20 = smov 0   ;;  %s898_s21 = smov 0  }
   0x3   :  { %s900_s22 = smov 0   ;;  %s902_s23 = smov 0  }
   0x4 LB: > { %s594_s24 = sadd.s32 4294967295, %s858_s23   ;;  %s595_s25 = sadd.s32 4294967294, %s858_s23   ;;  %s858_s23 = sphi %s902_s23, %s18_s23   ;;  %s854_s22 = sphi %s900_s22, %s1132_s22   ;;  %s850_s21 = sphi %s898_s21, %s1131_s21   ;;  %s846_s20 = sphi %s896_s20, %s1130_s20   ;;  %s842_s19 = sphi %s894_s19, %s1129_s19   ;;  %s838_s18 = sphi %s892_s18, %s1128_s18  }
   0x5   : > { %s30_s26 = sadd.s32 1, %s854_s22  ;;  %s156_s27 = sadd.s32 1, %s846_s20 }
   0x6   : > { %p32_p0 = scmp.ge.s32.totalorder %s30_s26, 2  ;;  %p166_p1 = scmp.ne.s32.totalorder %s846_s20, %s842_s19 }
   0x7   : > { %p167_p2 = scmp.eq.s32.totalorder %s594_s24, 1  ;;  %p172_p3 = scmp.ne.s32.totalorder %s842_s19, %s838_s18 }
   0x8   : > { %s1134_s26 = smov (%p32_p0, %s30_s26), 0  ;;  %p173_p5 = scmp.eq.s32.totalorder %s595_s25, 1 }
   0x9   : > { %p932_p4 = por %p167_p2, %p166_p1  ;;  %s151_s29 = ssub.s32 %s854_s22, %s1134_s26 }
   0xa   : > { %p598_p6 = scmp.ge.s32.totalorder %s858_s23, 1  ;;  %p154_p7 = scmp.eq.s32.totalorder %s151_s29, 0 }
   0xb   : > { %p939_p8 = por %p173_p5, %p172_p3  ;;  %p219_p9 = scmp.lt.s32.totalorder %s858_s23, 3 }
   0xc   : > { %s945_s6 = scalar_select %p154_p7, %s846_s20, %s156_s27  }
   0xd   : > { %p220_p10 = pnand %p598_p6, %p219_p9 }
   0xe   : > { %p254_p11 = scmp.lt.s32.totalorder (!%p220_p10), %s850_s21, 1  ;;  %s251_s9 = sand.u32 (!%p220_p10), 1, %s842_s19  }
   0xf   : > { %223 = sbr.rel (%p220_p10) target bundleno = 333 (0x14d), region = 40  ;;  %s622_s10 = sshll.u32 (!%p220_p10), %s850_s21, 4 }
  0x10   : > { %s513_s15 = scalar_lea.hbm (!%p220_p10), %s1125_s5, %s622_s10  ;;  %s861_s24 = smov (!%p220_p10), [#allocation2]  }
  0x14   : > { %vm301_vm0 = vcmask 261120   ;;  %v282_v0 = vld [vmem:[%s1122_s2] sm:$0xff]  ;;  %v284_v1 = vld [vmem:[%s1122_s2 + $0x10] sm:$0xff]  ;;  %s255_s11 = scalar_select %p254_p11, %s850_s21, 1  ;;  %v860_v2 = vmov 0   ;;  %v289_v5 = vld [vmem:[%s1123_s3 + $0x18] sm:$0xff] }
  0x15   : > { %678 = vmatprep.mubr.msk.f32.mxu0 %vm301_vm0, %v282_v0  ;;  %681 = vmatprep.mubr.msk.f32.mxu1 %vm301_vm0, %v284_v1  ;;  %v288_v3 = vld [vmem:[%s1123_s3 + $0x10] sm:$0xff]  ;;  %v286_v4 = vld [vmem:[%s1123_s3] sm:$0xff]  ;;  %v287_v6 = vld [vmem:[%s1123_s3 + $0x8] sm:$0xff] }
  0x16   : > { %773 = vset.pattern.permute.xlu1 %v860_v2  ;;  %772 = vset.pattern.permute.xlu0 %v860_v2  ;;  %s625_s16 = sshll.u32 %s255_s11, 7  ;;  %s265_s25 = scalar_lea.vmem %s1121_s1, %s255_s11  ;;  %v464_v23 = vld [vmem:[%s1124_s4 + $0x8] sm:$0xff]  ;;  %v465_v25 = vld [vmem:[%s1124_s4 + $0x10] sm:$0xff]  ;;  %v463_v27 = vld [vmem:[%s1124_s4] sm:$0xff] }
  0x17   : > { %s975_s12 = scalar_lea.vmem %s1120_s0, %s625_s16  ;;  %v601_v7 = vld [vmem:[%s265_s25] ss:$0 sm:$0xff]  ;;  %v466_v28 = vld [vmem:[%s1124_s4 + $0x18] sm:$0xff]  ;;  %v283_v36 = vld [vmem:[%s1122_s2 + $0x8] sm:$0xff]  ;;  %s502_s16 = scalar_lea.sflag [#allocation3], %s251_s9 }
  0x18   : > { %v281_v8 = vld [vmem:[%s975_s12 + $0x78] sm:$0xff]  ;;  %v280_v9 = vld [vmem:[%s975_s12 + $0x70] sm:$0xff]  ;;  %v299_v10 = vmul.f32 %v601_v7, %v288_v3  ;;  %v297_v11 = vmul.f32 %v601_v7, %v286_v4  ;;  %v300_v12 = vmul.f32 %v601_v7, %v289_v5  ;;  %v298_v13 = vmul.f32 %v601_v7, %v287_v6  ;;  %v279_v16 = vld [vmem:[%s975_s12 + $0x68] sm:$0xff]  ;;  %s786_s25 = sshll.u32 %s861_s24, 4  ;;  %s787_s25 = int_to_ptr.vmem [resolvable:$false] %s786_s25 }
  0x19   : > { %646 = vmatprep.subr.msk.mxu0 %vm301_vm0, %v281_v8  ;;  %684 = vmatprep.subr.msk.mxu1 %vm301_vm0, %v281_v8  ;;  %v278_v19 = vld [vmem:[%s975_s12 + $0x60] sm:$0xff]  ;;  %v277_v20 = vld [vmem:[%s975_s12 + $0x58] sm:$0xff]  ;;  %v276_v21 = vld [vmem:[%s975_s12 + $0x50] sm:$0xff]  ;;  %s788_s21 = scalar_lea.vmem %s787_s25, 32 }
  0x1a   : > { %647 = vmatpush3.xpose.msk.msra.mxu0 %vm301_vm0, %v281_v8  ;;  %700 = vmatpush3.xpose.msk.msra.mxu1 %vm301_vm0, %v281_v8  ;;  %v308_v14 = vsel %vm301_vm0, %v299_v10, 0.0  ;;  %v302_v15 = vsel %vm301_vm0, %v297_v11, 0.0  ;;  %v311_v17 = vsel %vm301_vm0, %v300_v12, 0.0  ;;  %v305_v18 = vsel %vm301_vm0, %v298_v13, 0.0  ;;  %v275_v22 = vld [vmem:[%s975_s12 + $0x48] sm:$0xff]  ;;  %v274_v24 = vld [vmem:[%s975_s12 + $0x40] sm:$0xff] }
  0x1b   : > { %648 = vmatprep.subr.msk.mxu0 %vm301_vm0, %v280_v9  ;;  %685 = vmatprep.subr.msk.mxu1 %vm301_vm0, %v280_v9  ;;  %v273_v26 = vld [vmem:[%s975_s12 + $0x38] sm:$0xff]  ;;  %v272_v29 = vld [vmem:[%s975_s12 + $0x30] sm:$0xff]  ;;  %v271_v30 = vld [vmem:[%s975_s12 + $0x28] sm:$0xff] }
  0x1c   : > { %309 = vadd.xlane.f32.xlu1 %v308_v14  ;;  %303 = vadd.xlane.f32.xlu0 %v302_v15  ;;  %v270_v31 = vld [vmem:[%s975_s12 + $0x20] sm:$0xff]  ;;  %v269_v32 = vld [vmem:[%s975_s12 + $0x18] sm:$0xff]  ;;  %v268_v33 = vld [vmem:[%s975_s12 + $0x10] sm:$0xff] }
  0x1d   : > { %v267_v34 = vld [vmem:[%s975_s12 + $0x8] sm:$0xff]  ;;  %v266_v35 = vld [vmem:[%s975_s12] sm:$0xff]  ;;  %v285_v37 = vld [vmem:[%s1122_s2 + $0x18] sm:$0xff]  ;;  %s252_s12 = scalar_lea.vmem [#allocation2], %s251_s9 }
  0x1e   : > { %649 = vmatpush3.xpose.msk.msra.mxu0 %vm301_vm0, %v280_v9  ;;  %701 = vmatpush3.xpose.msk.msra.mxu1 %vm301_vm0, %v280_v9  ;;  %s515_s11 = sshll.u32 %s252_s12, 4  ;;  %s516_s11 = int_to_ptr.vmem [resolvable:$true] %s515_s11 }
  0x1f   : > { %650 = vmatprep.subr.msk.mxu0 %vm301_vm0, %v279_v16  ;;  %686 = vmatprep.subr.msk.mxu1 %vm301_vm0, %v279_v16  ;;  %s782_s17 = scalar_lea.vmem %s516_s11, 16  ;;  %p789_p1 = scmp.lt.s32.totalorder %s516_s11, %s787_s25 }
  0x20   : > { %312 = vadd.xlane.f32.xlu1 %v311_v17  ;;  %306 = vadd.xlane.f32.xlu0 %v305_v18  ;;  %p783_p12 = scmp.ne.s32.totalorder %s516_s11, %s782_s17  ;;  %p790_p2 = scmp.lt.s32.totalorder %s788_s21, %s782_s17 }
  0x22   : > { %651 = vmatpush3.xpose.msk.msra.mxu0 %vm301_vm0, %v279_v16  ;;  %702 = vmatpush3.xpose.msk.msra.mxu1 %vm301_vm0, %v279_v16  ;;  %p784_p13 = pnand %p783_p12, %p932_p4  ;;  %p791_p3 = por %p790_p2, %p789_p1 }
  0x23   : > { %652 = vmatprep.subr.msk.mxu0 %vm301_vm0, %v278_v19  ;;  %687 = vmatprep.subr.msk.mxu1 %vm301_vm0, %v278_v19 }
  0x24   : > { %p785_p0 = pneg %p784_p13 }
  0x26   : > { %653 = vmatpush3.xpose.msk.msra.mxu0 %vm301_vm0, %v278_v19  ;;  %703 = vmatpush3.xpose.msk.msra.mxu1 %vm301_vm0, %v278_v19  ;;  %p792_p5 = pnand %p791_p3, %p785_p0 }
  0x27   : > { %654 = vmatprep.subr.msk.mxu0 %vm301_vm0, %v277_v20  ;;  %688 = vmatprep.subr.msk.mxu1 %vm301_vm0, %v277_v20 }
  0x2a   : > { %655 = vmatpush3.xpose.msk.msra.mxu0 %vm301_vm0, %v277_v20  ;;  %704 = vmatpush3.xpose.msk.msra.mxu1 %vm301_vm0, %v277_v20 }
  0x2b   : > { %656 = vmatprep.subr.msk.mxu0 %vm301_vm0, %v276_v21  ;;  %689 = vmatprep.subr.msk.mxu1 %vm301_vm0, %v276_v21 }
  0x2e   : > { %657 = vmatpush3.xpose.msk.msra.mxu0 %vm301_vm0, %v276_v21  ;;  %705 = vmatpush3.xpose.msk.msra.mxu1 %vm301_vm0, %v276_v21 }
  0x2f   : > { %658 = vmatprep.subr.msk.mxu0 %vm301_vm0, %v275_v22  ;;  %690 = vmatprep.subr.msk.mxu1 %vm301_vm0, %v275_v22 }
  0x31   : > { %474 = vperm.xlu1 %773, %v464_v23  }
  0x32   : > { %659 = vmatpush3.xpose.msk.msra.mxu0 %vm301_vm0, %v275_v22  ;;  %706 = vmatpush3.xpose.msk.msra.mxu1 %vm301_vm0, %v275_v22 }
  0x33   : > { %660 = vmatprep.subr.msk.mxu0 %vm301_vm0, %v274_v24  ;;  %691 = vmatprep.subr.msk.mxu1 %vm301_vm0, %v274_v24 }
  0x35   : > { %479 = vperm.xlu1 %773, %v465_v25  }
  0x36   : > { %661 = vmatpush3.xpose.msk.msra.mxu0 %vm301_vm0, %v274_v24  ;;  %707 = vmatpush3.xpose.msk.msra.mxu1 %vm301_vm0, %v274_v24 }
  0x37   : > { %662 = vmatprep.subr.msk.mxu0 %vm301_vm0, %v273_v26  ;;  %692 = vmatprep.subr.msk.mxu1 %vm301_vm0, %v273_v26 }
  0x38   : > { %469 = vperm.xlu0 %772, %v463_v27  }
  0x39   : > { %484 = vperm.xlu1 %773, %v466_v28  }
  0x3a   : > { %663 = vmatpush3.xpose.msk.msra.mxu0 %vm301_vm0, %v273_v26  ;;  %708 = vmatpush3.xpose.msk.msra.mxu1 %vm301_vm0, %v273_v26 }
  0x3b   : > { %664 = vmatprep.subr.msk.mxu0 %vm301_vm0, %v272_v29  ;;  %693 = vmatprep.subr.msk.mxu1 %vm301_vm0, %v272_v29 }
  0x3e   : > { %665 = vmatpush3.xpose.msk.msra.mxu0 %vm301_vm0, %v272_v29  ;;  %709 = vmatpush3.xpose.msk.msra.mxu1 %vm301_vm0, %v272_v29 }
  0x3f   : > { %666 = vmatprep.subr.msk.mxu0 %vm301_vm0, %v271_v30  ;;  %694 = vmatprep.subr.msk.mxu1 %vm301_vm0, %v271_v30 }
  0x42   : > { %667 = vmatpush3.xpose.msk.msra.mxu0 %vm301_vm0, %v271_v30  ;;  %710 = vmatpush3.xpose.msk.msra.mxu1 %vm301_vm0, %v271_v30 }
  0x43   : > { %668 = vmatprep.subr.msk.mxu0 %vm301_vm0, %v270_v31  ;;  %695 = vmatprep.subr.msk.mxu1 %vm301_vm0, %v270_v31 }
  0x46   : > { %669 = vmatpush3.xpose.msk.msra.mxu0 %vm301_vm0, %v270_v31  ;;  %711 = vmatpush3.xpose.msk.msra.mxu1 %vm301_vm0, %v270_v31 }
  0x47   : > { %670 = vmatprep.subr.msk.mxu0 %vm301_vm0, %v269_v32  ;;  %696 = vmatprep.subr.msk.mxu1 %vm301_vm0, %v269_v32 }
  0x4a   : > { %671 = vmatpush3.xpose.msk.msra.mxu0 %vm301_vm0, %v269_v32  ;;  %712 = vmatpush3.xpose.msk.msra.mxu1 %vm301_vm0, %v269_v32 }
  0x4b   : > { %672 = vmatprep.subr.msk.mxu0 %vm301_vm0, %v268_v33  ;;  %697 = vmatprep.subr.msk.mxu1 %vm301_vm0, %v268_v33 }
  0x4e   : > { %673 = vmatpush3.xpose.msk.msra.mxu0 %vm301_vm0, %v268_v33  ;;  %713 = vmatpush3.xpose.msk.msra.mxu1 %vm301_vm0, %v268_v33 }
  0x4f   : > { %674 = vmatprep.subr.msk.mxu0 %vm301_vm0, %v267_v34  ;;  %698 = vmatprep.subr.msk.mxu1 %vm301_vm0, %v267_v34 }
  0x52   : > { %675 = vmatpush3.xpose.msk.msra.mxu0 %vm301_vm0, %v267_v34  ;;  %714 = vmatpush3.xpose.msk.msra.mxu1 %vm301_vm0, %v267_v34 }
  0x53   : > { %676 = vmatprep.subr.msk.mxu0 %vm301_vm0, %v266_v35  ;;  %699 = vmatprep.subr.msk.mxu1 %vm301_vm0, %v266_v35 }
  0x56   : > { %677 = vmatpush3.xpose.msk.msra.mxu0 %vm301_vm0, %v266_v35  ;;  %715 = vmatpush3.xpose.msk.msra.mxu1 %vm301_vm0, %v266_v35 }
  0x59   : > { %679 = vmatmul.mubr.msk.f32.vlgmr.msra.gmra.mxu0 %vm301_vm0, %v283_v36  ;;  %682 = vmatmul.mubr.msk.f32.vlgmr.msra.gmra.mxu1 %vm301_vm0, %v285_v37 }
  0xa5   : > { %v304_v38 = vpop.xlane.xlu0 %303  ;;  %v310_v39 = vpop.xlane.xlu1 %309 }
  0xa9   : > { %v307_v40 = vpop.xlane.xlu0 %306  ;;  %v313_v41 = vpop.xlane.xlu1 %312 }
  0xad   : > { %v475_v50 = vpop.permute.xlu1 %474 }
  0xb1   : > { %v480_v52 = vpop.permute.xlu1 %479 }
  0xb3   : > { %v470_v53 = vpop.permute.xlu0 %469 }
  0xb5   : > { %v485_v61 = vpop.permute.xlu1 %484 }
 0x119   : > { %v680_v42 = vpop.f32.mrf.mxu0  ;;  %v683_v43 = vpop.f32.mrf.mxu1 }
 0x11a   : > { %v446_v44 = vadd.f32 %v680_v42, %v307_v40  ;;  %v456_v47 = vadd.f32 %v683_v43, %v313_v41 }
 0x11b   : > { %v440_v45 = vpop.f32.mrf.mxu0  ;;  %v450_v46 = vpop.f32.mrf.mxu1 }
 0x11c   : > { %774 = vtanh.f32 %v446_v44  ;;  %v441_v48 = vadd.f32 %v440_v45, %v304_v38  ;;  %v451_v49 = vadd.f32 %v450_v46, %v310_v39 }
 0x11e   : > { %776 = vtanh.f32 %v441_v48 }
 0x11f   : > { %778 = vtanh.f32 %v451_v49 }
 0x120   : > { %780 = vtanh.f32 %v456_v47 }
 0x129   : > { %v775_v51 = vpop.eup %774 }
 0x12a   : > { %v488_v56 = vmul.f32 %v775_v51, %v475_v50 }
 0x12b   : > { %v777_v54 = vpop.eup %776 }
 0x12c   : > { %v779_v55 = vpop.eup %778  ;;  %v487_v57 = vmul.f32 %v777_v54, %v470_v53 }
 0x12d   : > { %v781_v58 = vpop.eup %780  ;;  %v489_v59 = vmul.f32 %v779_v55, %v480_v52 }
 0x12e   : > { %v491_v60 = vadd.f32 %v488_v56, %v487_v57  ;;  %v490_v62 = vmul.f32 %v781_v58, %v485_v61 }
 0x130   : > { %v492_v63 = vadd.f32 %v491_v60, %v489_v59 }
 0x132   : > { %v493_v0 = vadd.f32 %v492_v63, %v490_v62 }
 0x134   : > { %v494_v1 = vrot.slane %v493_v0, 4 }
 0x136   : > { %v495_v2 = vadd.f32 %v494_v1, %v493_v0 }
 0x138   : > { %v496_v3 = vrot.slane %v495_v2, 2 }
 0x13a   : > { %v497_v4 = vadd.f32 %v496_v3, %v495_v2 }
 0x13c   : > { %v498_v5 = vrot.slane %v497_v4, 1 }
 0x13e   : > { %v499_v6 = vadd.f32 %v498_v5, %v497_v4 }
 0x140   : > { %500 = vst [vmem:[%s252_s12] sm:$0x1] %v499_v6 }
 0x141   : > { %795 = shalt.err (!%p792_p5)
}
 0x142   : > { %s796_s27 = scalar_lea.hbm %s513_s15, 16  ;;  %s800_s8 = scalar_lea.hbm %s1125_s5, 32 }
 0x143   : > { %p797_p6 = scmp.ne.s32.totalorder %s513_s15, %s796_s27  ;;  %p801_p10 = scmp.lt.s32.totalorder %s513_s15, %s1125_s5 }
 0x144   : > { %p802_p11 = scmp.lt.s32.totalorder %s800_s8, %s796_s27 }
 0x145   : > { %p798_p7 = pnand %p797_p6, %p932_p4 }
 0x146   : > { %p803_p12 = por %p802_p11, %p801_p10 }
 0x147   : > { %p799_p9 = pneg %p798_p7 }
 0x149   : > { %p804_p13 = pnand %p803_p12, %p799_p9 }
 0x14b   : > { %807 = shalt.err (!%p804_p13)
}
 0x14c   : > { %716 = dma.vmem_to_hbm [thread:$0]  (%p932_p4), %s516_s11, 16, %s513_s15, %s502_s16  }
 0x14d PF: > { %p722_p0 = scmp.ge.s32.totalorder %s858_s23, 2  ;;  %s527_s12 = sand.u32 1, %s838_s18  }
 0x14e   : > { %s528_s13 = scalar_lea.sflag [#allocation3], %s527_s12 }
 0x14f   : > { %p719_p1 = pnand %p722_p0, %p939_p8 }
 0x151   : > { %p720_p2 = pneg %p719_p1 }
 0x153   : > { %833 = dma.done.wait (%p720_p2), %s528_s13, 16  }
 0x154   : > { %835 = vsyncadd (%p720_p2), %s528_s13, 4294967280  ;;  %s18_s23 = sadd.s32 1, %s858_s23   ;;  %s1128_s18 = smov %s842_s19 }
 0x155   : > { %p15_p3 = scmp.ge.s32.totalorder %s18_s23, 4   ;;  %s1129_s19 = smov %s846_s20 }
 0x156   : > { %s1130_s20 = smov %s945_s6  ;;  %s1131_s21 = smov %s854_s22 }
 0x157   : > { %s1132_s22 = smov %s1134_s26  ;;  %17 = sbr.rel (!%p15_p3) target bundleno = 4 (0x4), region = 78 }
 0x15c   :  { %532 = vsyncpa [#allocation3], 1 }
 0x15d   :  { %534 = vsyncpa [#allocation3 + $0x1], 1 }

</bundles_post_ra>
